<compile_context>
chip_gen: v6e
topology: v6e:2x2x1
jax: 0.10.0
libtpu: 0.0.40
codegen_flags: <defaults>
</compile_context>

<pallas_src>
import functools

import jax
import jax.numpy as jnp
from jax.experimental import pallas as pl
from jax.experimental.pallas import tpu as pltpu

_LANE = 128


def _patch_embed_kernel(x_ref, w_ref, b_ref, o_ref):
    # x_ref: (TM, Kp)  patch-matrix row tile (bf16)
    # w_ref: (Kp, Npad) projection weights, VMEM-resident across the grid
    # b_ref: (1, Npad)  bias (f32)
    # o_ref: (TM, Npad) output tile
    acc = jnp.dot(x_ref[...], w_ref[...], preferred_element_type=jnp.float32)
    # Lean epilogue (single add + cast) stays off the critical path.
    o_ref[...] = (acc + b_ref[...]).astype(o_ref.dtype)


def _round_up(x, m):
    return (x + m - 1) // m * m


def _choose_row_tile(m):
    """Largest row tile <= 512 giving a multi-step grid; prefer an even number
    of steps so v7x's two TensorCores split the parallel axis evenly."""
    fallback = None
    for tm in (512, 256, 128, 64, 32, 16, 8):
        if m < 2 * tm:
            continue
        if fallback is None:
            fallback = tm
        if pl.cdiv(m, tm) % 2 == 0:
            return tm
    if fallback is not None:
        return fallback
    return m  # tiny M: single full block


def _vmem_estimate(tm, kp, n_pad, in_bytes, out_bytes, const_bufs):
    return (2 * tm * kp * in_bytes            # X tile, double-buffered
            + const_bufs * kp * n_pad * in_bytes   # weights
            + const_bufs * n_pad * 4               # bias (f32)
            + 2 * tm * n_pad * out_bytes)          # out tile, double-buffered


def _vmem_budget():
    try:
        cap = int(pltpu.get_tpu_info().vmem_capacity_bytes)
    except Exception:
        cap = 64 << 20  # conservative: v7x physical VMEM
    return cap - (8 << 20)  # headroom for Mosaic internal scratch


@functools.partial(
    jax.jit,
    static_argnames=("patch_size", "compute_dtype", "out_dtype",
                     "single_buffer_consts"))
def patch_embedding(x, weight, bias, *, patch_size,
                    compute_dtype=jnp.bfloat16, out_dtype=None,
                    single_buffer_consts=True):
    """x: (B, C, H, W) NCHW. weight: (embed_dim, C, P, P). bias: (embed_dim,).

    Returns (B, num_patches, embed_dim), matching
    Conv2d(C, embed_dim, k=P, stride=P)(x).flatten(2).transpose(1, 2).
    Note: MXU operands are bf16 (f32 accumulation), so results differ from a
    pure-f32 conv by bf16 rounding.  Set out_dtype=jnp.bfloat16 to also halve
    the output writeback if downstream layers accept bf16.
    """
    B, C, H, W = x.shape
    E = weight.shape[0]
    P = patch_size
    nh, nw = H // P, W // P
    num_patches = nh * nw
    M = B * num_patches
    K = C * P * P

    out_dtype = x.dtype if out_dtype is None else jnp.dtype(out_dtype)

    # --- XLA glue: NCHW -> (M, K) patch matrix, cast to bf16 FIRST so the
    # materialized transpose intermediate is half the bytes.  Feature order is
    # (C, kh, kw), matching the PyTorch Conv2d weight layout (E, C, kh, kw).
    xc = x.astype(compute_dtype)
    xp = xc.reshape(B, C, nh, P, nw, P)
    xp = xp.transpose(0, 2, 4, 1, 3, 5)              # (B, nh, nw, C, P, P)
    xp = xp.reshape(M, K)                            # (M, K)

    w = weight.reshape(E, K).T.astype(compute_dtype)  # (K, E)
    b = bias.reshape(1, E).astype(jnp.float32)        # (1, E)

    # --- Lane-dense projection width (unmasked stores); slice back afterwards.
    n_pad = _round_up(E, _LANE)
    if n_pad != E:
        w = jnp.pad(w, ((0, 0), (0, n_pad - E)))
        b = jnp.pad(b, ((0, 0), (0, n_pad - E)))

    # --- Pad K to a multiple of 128 only when it is already > 128 (avoids
    # inflating tiny-K traffic; removes masked lane loads for e.g. K=588).
    kp = K
    if K > _LANE and K % _LANE != 0:
        kp = _round_up(K, _LANE)
        xp = jnp.pad(xp, ((0, 0), (0, kp - K)))
        w = jnp.pad(w, ((0, kp - K), (0, 0)))

    in_bytes = jnp.dtype(compute_dtype).itemsize
    out_bytes = jnp.dtype(out_dtype).itemsize
    const_bufs = 1 if single_buffer_consts else 2

    # --- Tile choice + VMEM budget clamped to the chip's physical capacity.
    budget = _vmem_budget()
    tm = _choose_row_tile(M)
    while (tm >= 16
           and _vmem_estimate(tm, kp, n_pad, in_bytes, out_bytes, const_bufs)
           + (4 << 20) > budget):
        tm //= 2
    est = _vmem_estimate(tm, kp, n_pad, in_bytes, out_bytes, const_bufs)
    vmem_limit = min(budget, max(est + (4 << 20), 32 << 20))

    grid = (pl.cdiv(M, tm),)

    cost = pl.CostEstimate(
        flops=int(2 * M * kp * n_pad),
        transcendentals=0,
        bytes_accessed=int(M * kp * in_bytes + kp * n_pad * in_bytes
                           + n_pad * 4 + M * n_pad * out_bytes),
    )

    const_kwargs = (dict(pipeline_mode=pl.Buffered(1))
                    if single_buffer_consts else {})

    out = pl.pallas_call(
        _patch_embed_kernel,
        out_shape=jax.ShapeDtypeStruct((M, n_pad), out_dtype),
        grid=grid,
        in_specs=[
            pl.BlockSpec((tm, kp), lambda i: (i, 0)),
            # Constant index maps -> fetched once, VMEM-resident for the grid.
            pl.BlockSpec((kp, n_pad), lambda i: (0, 0), **const_kwargs),
            pl.BlockSpec((1, n_pad), lambda i: (0, 0), **const_kwargs),
        ],
        out_specs=pl.BlockSpec((tm, n_pad), lambda i: (i, 0)),
        compiler_params=pltpu.CompilerParams(
            dimension_semantics=("parallel",),
            vmem_limit_bytes=int(vmem_limit),
        ),
        cost_estimate=cost,
    )(xp, w, b)

    if n_pad != E:
        out = out[:, :E]
    return out.reshape(B, num_patches, E)


def reference_patch_matmul(x, weight, bias, *, patch_size, compute_dtype):
    """Pure-JAX reference on the exact same bf16 operands / f32 accumulation."""
    B, C, H, W = x.shape
    E = weight.shape[0]
    P = patch_size
    nh, nw = H // P, W // P
    xp = x.astype(compute_dtype).reshape(B, C, nh, P, nw, P)
    xp = xp.transpose(0, 2, 4, 1, 3, 5).reshape(B * nh * nw, C * P * P)
    w = weight.reshape(E, C * P * P).T.astype(compute_dtype)
    y = jnp.dot(xp, w, preferred_element_type=jnp.float32) + bias[None, :]
    return y.astype(x.dtype).reshape(B, nh * nw, E)


def reference_patch_embedding(x, weight, bias, *, patch_size):
    """Pure-JAX f32 reference: strided conv, then flatten/transpose."""
    y = jax.lax.conv_general_dilated(
        x, weight,
        window_strides=(patch_size, patch_size),
        padding="VALID",
        dimension_numbers=("NCHW", "OIHW", "NCHW"),
    ) + bias[None, :, None, None]
    B, E, nh, nw = y.shape
    return y.reshape(B, E, nh * nw).transpose(0, 2, 1)


if __name__ == "__main__":
    # Small shapes consistent with the module: hist_size=16, patch_size=4,
    # embed_dim=32, in_channels=4 -> num_patches = (16 // 4)^2 = 16.
    B, C, H = 2, 4, 16
    P = 4
    E = 32

    key = jax.random.PRNGKey(0)
    kx, kw, kb = jax.random.split(key, 3)
    x = jax.random.normal(kx, (B, C, H, H), dtype=jnp.float32)
    weight = jax.random.normal(kw, (E, C, P, P), dtype=jnp.float32) * 0.05
    bias = jax.random.normal(kb, (E,), dtype=jnp.float32) * 0.1

    def _run(single_buffer_consts):
        o = patch_embedding(x, weight, bias, patch_size=P,
                            single_buffer_consts=single_buffer_consts)
        return jax.block_until_ready(o)

    try:
        out = _run(True)
    except Exception:
        # pl.Buffered(1) on the constant weight/bias blocks is a VMEM-only
        # optimization; fall back to default double buffering if this
        # jax/Mosaic build rejects single buffering.
        out = _run(False)

    assert out.shape == (B, (H // P) ** 2, E), out.shape

    # Exact-path reference: same bf16 operands + f32 accumulation.
    ref_exact = reference_patch_matmul(
        x, weight, bias, patch_size=P, compute_dtype=jnp.bfloat16)
    assert jnp.allclose(out, ref_exact, atol=2e-3, rtol=2e-3), float(
        jnp.max(jnp.abs(out - ref_exact)))

    # Semantic reference: f32 Conv2d(k=P, stride=P) -> flatten -> transpose
    # (loose tolerance accounts for the bf16 operand rounding).
    ref_conv = reference_patch_embedding(x, weight, bias, patch_size=P)
    assert jnp.allclose(out, ref_conv, atol=5e-2, rtol=5e-2), float(
        jnp.max(jnp.abs(out - ref_conv)))

    print("KERNEL_OK")
</pallas_src>

<mosaic_0001>
module attributes {stable_mosaic.version = 11 : i64} {
  func.func @_patch_embed_kernel(%arg0: i32, %arg1: memref<16x64xbf16, #tpu.memory_space<vmem>>, %arg2: memref<64x128xbf16, #tpu.memory_space<vmem>>, %arg3: memref<1x128xf32, #tpu.memory_space<vmem>>, %arg4: memref<16x128xf32, #tpu.memory_space<vmem>>) attributes {dimension_semantics = [#tpu.dimension_semantics<parallel>], iteration_bounds = array<i64: 2>, scalar_prefetch = 0 : i64, scratch_operands = 0 : i64, tpu.core_type = #tpu.core_type<tc>, window_params = [{transform_indices = @transform_0, window_bounds = array<i64: 16, 64>}, {pipeline_mode = #tpu.pipeline_mode<synchronous>, transform_indices = @transform_1, window_bounds = array<i64: 64, 128>}, {pipeline_mode = #tpu.pipeline_mode<synchronous>, transform_indices = @transform_2, window_bounds = array<i64: 1, 128>}, {transform_indices = @transform_3, window_bounds = array<i64: 16, 128>}]} {
    %c0 = arith.constant 0 : index
    %c0_0 = arith.constant 0 : index
    %0 = vector.load %arg1[%c0, %c0_0] : memref<16x64xbf16, #tpu.memory_space<vmem>>, vector<16x64xbf16>
    %c0_1 = arith.constant 0 : index
    %c0_2 = arith.constant 0 : index
    %1 = vector.load %arg2[%c0_1, %c0_2] : memref<64x128xbf16, #tpu.memory_space<vmem>>, vector<64x128xbf16>
    %cst = arith.constant dense<0.000000e+00> : vector<16x128xf32>
    %2 = tpu.matmul %0, %1, %cst {dimension_numbers = #tpu.dot_dimension_numbers<[1], [0], [0], [1], [0, 0, 1, 1], [], []>} : vector<16x64xbf16>, vector<64x128xbf16>, vector<16x128xf32> -> vector<16x128xf32>
    %c0_3 = arith.constant 0 : index
    %c0_4 = arith.constant 0 : index
    %3 = vector.load %arg3[%c0_3, %c0_4] : memref<1x128xf32, #tpu.memory_space<vmem>>, vector<1x128xf32>
    %4 = vector.broadcast %3 : vector<1x128xf32> to vector<16x128xf32>
    %5 = arith.addf %2, %4 : vector<16x128xf32>
    %c0_5 = arith.constant 0 : index
    %c0_6 = arith.constant 0 : index
    %6 = vector.load %arg4[%c0_5, %c0_6] : memref<16x128xf32, #tpu.memory_space<vmem>>, vector<16x128xf32>
    tpu.vector_store %arg4[%c0_5, %c0_6], %5 {strides = array<i32>} : memref<16x128xf32, #tpu.memory_space<vmem>>, vector<16x128xf32>,
    return
  }
  func.func @transform_0(%arg0: i32) -> (i32, i32) {
    %c0_i32 = arith.constant 0 : i32
    %c0_i32_0 = arith.constant 0 : i32
    return %arg0, %c0_i32 : i32, i32
  }
  func.func @transform_1(%arg0: i32) -> (i32, i32) {
    %c0_i32 = arith.constant 0 : i32
    %c0_i32_0 = arith.constant 0 : i32
    %c0_i32_1 = arith.constant 0 : i32
    return %c0_i32, %c0_i32_0 : i32, i32
  }
  func.func @transform_2(%arg0: i32) -> (i32, i32) {
    %c0_i32 = arith.constant 0 : i32
    %c0_i32_0 = arith.constant 0 : i32
    %c0_i32_1 = arith.constant 0 : i32
    return %c0_i32, %c0_i32_0 : i32, i32
  }
  func.func @transform_3(%arg0: i32) -> (i32, i32) {
    %c0_i32 = arith.constant 0 : i32
    %c0_i32_0 = arith.constant 0 : i32
    return %arg0, %c0_i32 : i32, i32
  }
}

module attributes {stable_mosaic.version = 11 : i64} {
  func.func @_patch_embed_kernel(%arg0: i32, %arg1: memref<16x64xbf16, #tpu.memory_space<vmem>>, %arg2: memref<64x128xbf16, #tpu.memory_space<vmem>>, %arg3: memref<1x128xf32, #tpu.memory_space<vmem>>, %arg4: memref<16x128xf32, #tpu.memory_space<vmem>>) attributes {dimension_semantics = [#tpu.dimension_semantics<parallel>], iteration_bounds = array<i64: 2>, scalar_prefetch = 0 : i64, scratch_operands = 0 : i64, tpu.core_type = #tpu.core_type<tc>, window_params = [{transform_indices = @transform_0, window_bounds = array<i64: 16, 64>}, {pipeline_mode = #tpu.pipeline_mode<synchronous>, transform_indices = @transform_1, window_bounds = array<i64: 64, 128>}, {pipeline_mode = #tpu.pipeline_mode<synchronous>, transform_indices = @transform_2, window_bounds = array<i64: 1, 128>}, {transform_indices = @transform_3, window_bounds = array<i64: 16, 128>}]} {
    %c0 = arith.constant 0 : index
    %c0_0 = arith.constant 0 : index
    %0 = vector.load %arg1[%c0, %c0_0] : memref<16x64xbf16, #tpu.memory_space<vmem>>, vector<16x64xbf16>
    %c0_1 = arith.constant 0 : index
    %c0_2 = arith.constant 0 : index
    %1 = vector.load %arg2[%c0_1, %c0_2] : memref<64x128xbf16, #tpu.memory_space<vmem>>, vector<64x128xbf16>
    %cst = arith.constant dense<0.000000e+00> : vector<16x128xf32>
    %2 = tpu.matmul %0, %1, %cst {dimension_numbers = #tpu.dot_dimension_numbers<[1], [0], [0], [1], [0, 0, 1, 1], [], []>} : vector<16x64xbf16>, vector<64x128xbf16>, vector<16x128xf32> -> vector<16x128xf32>
    %c0_3 = arith.constant 0 : index
    %c0_4 = arith.constant 0 : index
    %3 = vector.load %arg3[%c0_3, %c0_4] : memref<1x128xf32, #tpu.memory_space<vmem>>, vector<1x128xf32>
    %4 = vector.broadcast %3 : vector<1x128xf32> to vector<16x128xf32>
    %5 = arith.addf %2, %4 : vector<16x128xf32>
    %c0_5 = arith.constant 0 : index
    %c0_6 = arith.constant 0 : index
    %6 = vector.load %arg4[%c0_5, %c0_6] : memref<16x128xf32, #tpu.memory_space<vmem>>, vector<16x128xf32>
    tpu.vector_store %arg4[%c0_5, %c0_6], %5 {strides = array<i32>} : memref<16x128xf32, #tpu.memory_space<vmem>>, vector<16x128xf32>,
    return
  }
  func.func @transform_0(%arg0: i32) -> (i32, i32) {
    %c0_i32 = arith.constant 0 : i32
    %c0_i32_0 = arith.constant 0 : i32
    return %arg0, %c0_i32 : i32, i32
  }
  func.func @transform_1(%arg0: i32) -> (i32, i32) {
    %c0_i32 = arith.constant 0 : i32
    %c0_i32_0 = arith.constant 0 : i32
    %c0_i32_1 = arith.constant 0 : i32
    return %c0_i32, %c0_i32_0 : i32, i32
  }
  func.func @transform_2(%arg0: i32) -> (i32, i32) {
    %c0_i32 = arith.constant 0 : i32
    %c0_i32_0 = arith.constant 0 : i32
    %c0_i32_1 = arith.constant 0 : i32
    return %c0_i32, %c0_i32_0 : i32, i32
  }
  func.func @transform_3(%arg0: i32) -> (i32, i32) {
    %c0_i32 = arith.constant 0 : i32
    %c0_i32_0 = arith.constant 0 : i32
    return %arg0, %c0_i32 : i32, i32
  }
}

</mosaic_0001>

<bundles_post_ra>
// kernel: patch_embedding.1
= control target key start
LH: loop header
LB: loop body
LE: loop exit
PB: predicated region body
PF: predicated region fallthrough
CT: control target
= control target key end

     0   :  { %8 = vsyncpa [#allocation3], 0  ;;  %s630_s0 = inlined_call_operand.vmem [shape: bf16[32,64], index: 0, kind: input, shape index: {}]   ;;  %s631_s1 = inlined_call_operand.vmem [shape: bf16[64,128], index: 1, kind: input, shape index: {}]   ;;  %s632_s2 = inlined_call_operand.vmem [shape: f32[1,128], index: 2, kind: input, shape index: {}]   ;;  %s633_s3 = inlined_call_operand.hbm [shape: f32[32,128], index: 3, kind: output, shape index: {}]  }
   0x1   :  { %10 = vsyncpa [#allocation3 + $0x1], 0  ;;  %s514_s12 = smov 0   ;;  %s516_s13 = smov 0  }
   0x2   :  { %s518_s14 = smov 0   ;;  %s520_s15 = smov 0  }
   0x3 LB: > { %s535_s16 = sadd.s32 4294967295, %s487_s15   ;;  %s342_s17 = sadd.s32 4294967294, %s487_s15   ;;  %s487_s15 = sphi %s520_s15, %s639_s15   ;;  %s483_s14 = sphi %s518_s14, %s638_s14   ;;  %s479_s13 = sphi %s516_s13, %s637_s13   ;;  %s475_s12 = sphi %s514_s12, %s636_s12  }
   0x4   : > { %s539_s18 = sadd.s32 1, %s487_s15   ;;  %s91_s19 = sadd.s32 1, %s483_s14 }
   0x5   : > { %s88_s20 = ssub.s32 %s487_s15, %s539_s18  ;;  %p101_p0 = scmp.ne.s32.totalorder %s483_s14, %s479_s13 }
   0x6   : > { %p89_p1 = scmp.eq.s32.totalorder %s88_s20, 0  ;;  %p102_p2 = scmp.eq.s32.totalorder %s535_s16, 1 }
   0x7   : > { %p107_p3 = scmp.ne.s32.totalorder %s479_s13, %s475_s12  ;;  %p108_p4 = scmp.eq.s32.totalorder %s342_s17, 1 }
   0x8   : > { %s550_s21 = scalar_select %p89_p1, %s483_s14, %s91_s19  }
   0x9   : > { %p552_p5 = por %p102_p2, %p101_p0  ;;  %p556_p6 = por %p108_p4, %p107_p3 }
   0xa   : > { %p345_p7 = scmp.ge.s32.totalorder %s487_s15, 1  ;;  %p141_p8 = scmp.lt.s32.totalorder %s487_s15, 3 }
   0xc   : > { %p142_p9 = pnand %p345_p7, %p141_p8 }
   0xd   : > { %s347_s28 = sshll.u32 (!%p142_p9), %s535_s16, 1  ;;  %s162_s10 = sand.u32 (!%p142_p9), 1, %s479_s13  }
   0xe   : > { %145 = sbr.rel (%p142_p9) target bundleno = 249 (0xf9), region = 32  ;;  %p166_p10 = scmp.lt.s32.totalorder (!%p142_p9), %s347_s28, 3 }
   0xf   : > { %s346_s11 = sshll.u32 (!%p142_p9), %s162_s10, 4  ;;  %s361_s25 = sshll.u32 (!%p142_p9), %s535_s16, 8 }
  0x10   : > { %s164_s20 = scalar_lea.vmem (!%p142_p9), [#allocation2], %s346_s11  ;;  %s590_s29 = scalar_lea.sflag (!%p142_p9), [#allocation3], %s162_s10 }
  0x11   : > { %s280_s24 = sshll.u32 (!%p142_p9), %s164_s20, 4  ;;  %s491_s16 = smov (!%p142_p9), [#allocation2]   ;;  %s583_s24 = int_to_ptr.vmem [resolvable:$true] %s280_s24 }
  0x12   : > { %s427_s30 = scalar_lea.vmem (!%p142_p9), %s583_s24, 256 }
  0x13   : > { %v422_v0 = vld [vmem:[%s631_s1 + $0x18] sm:$0xff]   ;;  %v489_v1 = vmov 0.0   ;;  %v423_v2 = vld [vmem:[%s631_s1 + $0x10] sm:$0xff]   ;;  %vm490_vm0 = vmmov 0   ;;  %s641_s28 = smov (!%p166_p10, %s347_s28), 3  ;;  %v424_v3 = vld [vmem:[%s631_s1 + $0x8] sm:$0xff]   ;;  %p428_p11 = scmp.ne.s32.totalorder %s583_s24, %s427_s30 }
  0x14   : > { %367 = vmatprep.subr.bf16.mxu0 %v489_v1  ;;  %375 = vmatprep.mubr.msk.bf16.mxu0 %vm490_vm0, %v489_v1  ;;  %s348_s4 = sshll.u32 %s641_s28, 2  ;;  %v425_v4 = vld [vmem:[%s631_s1] sm:$0xff]   ;;  %vm219_vm1 = vcmask 523264   ;;  %s588_s28 = scalar_lea.hbm %s633_s3, %s361_s25 }
  0x15   : > { %368 = vmatpush3.bf16.msra.mxu0 %v422_v0  ;;  %s169_s7 = scalar_lea.vmem %s630_s0, %s348_s4  ;;  %v349_v6 = vld [vmem:[%s632_s2] ss:$0 sm:$0xff]  ;;  %p429_p12 = pnand %p428_p11, %p552_p5 }
  0x16   : > { %369 = vmatprep.subr.bf16.mxu0 %v489_v1  ;;  %v426_v5 = vld [vmem:[%s169_s7] sm:$0xff]   ;;  %s431_s4 = sshll.u32 %s491_s16, 4  ;;  %s432_s4 = int_to_ptr.vmem [resolvable:$false] %s431_s4 }
  0x17   : > { %p430_p13 = pneg %p429_p12  ;;  %s433_s5 = scalar_lea.vmem %s432_s4, 512 }
  0x18   : > { %p434_p0 = scmp.lt.s32.totalorder %s583_s24, %s432_s4  ;;  %p435_p1 = scmp.lt.s32.totalorder %s433_s5, %s427_s30 }
  0x19   : > { %370 = vmatpush3.bf16.msra.mxu0 %v423_v2 }
  0x1a   : > { %371 = vmatprep.subr.bf16.mxu0 %v489_v1  ;;  %p436_p2 = por %p435_p1, %p434_p0 }
  0x1c   : > { %p437_p3 = pnand %p436_p2, %p430_p13 }
  0x1d   : > { %372 = vmatpush3.bf16.msra.mxu0 %v424_v3 }
  0x1e   : > { %373 = vmatprep.subr.bf16.mxu0 %v489_v1 }
  0x21   : > { %374 = vmatpush3.bf16.msra.mxu0 %v425_v4 }
  0x24   : > { %376 = vmatmul.mubr.msk.bf16.vlgmr.msra.gmra.mxu0 %vm219_vm1, %v426_v5 }
  0xe4   : > { %v257_v7 = vpop.f32.mrf.mxu0 }
  0xe5   : > { %v258_v8 = vadd.f32 %v349_v6, %v257_v7 }
  0xe6   : > { %v377_v9 = vpop.f32.mrf.mxu0 }
  0xe7   : > { %264 = vst [vmem:[%s164_s20] sm:$0xff] %v258_v8 }
  0xe8   : > { %v260_v10 = vpop.f32.mrf.mxu0 }
  0xe9   : > { %v261_v11 = vadd.f32 %v349_v6, %v260_v10 }
  0xea   : > { %v378_v12 = vpop.f32.mrf.mxu0 }
  0xeb   : > { %265 = vst [vmem:[%s164_s20 + $0x8] sm:$0xff] %v261_v11 }
  0xec   : > { %440 = shalt.err (!%p437_p3)
}
  0xed   : > { %s441_s6 = scalar_lea.hbm %s588_s28, 256  ;;  %s445_s9 = scalar_lea.hbm %s633_s3, 512 }
  0xee   : > { %p442_p4 = scmp.ne.s32.totalorder %s588_s28, %s441_s6  ;;  %p446_p9 = scmp.lt.s32.totalorder %s588_s28, %s633_s3 }
  0xef   : > { %p447_p10 = scmp.lt.s32.totalorder %s445_s9, %s441_s6 }
  0xf0   : > { %p443_p7 = pnand %p442_p4, %p552_p5 }
  0xf1   : > { %p448_p11 = por %p447_p10, %p446_p9 }
  0xf2   : > { %p444_p8 = pneg %p443_p7 }
  0xf4   : > { %p449_p12 = pnand %p448_p11, %p444_p8 }
  0xf6   : > { %452 = shalt.err (!%p449_p12)
}
  0xf7   : > { %s492_s17 = smov 128   ;;  %s493_s19 = smov 8  }
  0xf8   : > { %379 = dma.vmem_to_hbm [thread:$0]  (%p552_p5), %s583_s24, 256, %s588_s28, %s590_s29, %s492_s17, %s492_s17, %s493_s19  }
  0xf9 PF: > { %p385_p13 = scmp.ge.s32.totalorder %s487_s15, 2  ;;  %s295_s20 = sand.u32 1, %s475_s12  }
  0xfa   : > { %s296_s25 = scalar_lea.sflag [#allocation3], %s295_s20 }
  0xfb   : > { %p382_p0 = pnand %p385_p13, %p556_p6 }
  0xfd   : > { %p383_p1 = pneg %p382_p0 }
  0xff   : > { %470 = dma.done.wait (%p383_p1), %s296_s25, 256  }
 0x100   : > { %472 = vsyncadd (%p383_p1), %s296_s25, 4294967040  ;;  %p13_p2 = scmp.ge.s32.totalorder %s539_s18, 4   ;;  %s636_s12 = smov %s479_s13 }
 0x101   : > { %s637_s13 = smov %s483_s14  ;;  %s638_s14 = smov %s550_s21 }
 0x102   : > { %s639_s15 = smov %s539_s18  ;;  %15 = sbr.rel (!%p13_p2) target bundleno = 3 (0x3), region = 67 }
 0x107   :  { %301 = vsyncpa [#allocation3], 1 }
 0x108   :  { %303 = vsyncpa [#allocation3 + $0x1], 1 }

// kernel: patch_embedding.1
= control target key start
LH: loop header
LB: loop body
LE: loop exit
PB: predicated region body
PF: predicated region fallthrough
CT: control target
= control target key end

     0   :  { %8 = vsyncpa [#allocation3], 0  ;;  %s630_s0 = inlined_call_operand.vmem [shape: bf16[32,64], index: 0, kind: input, shape index: {}]   ;;  %s631_s1 = inlined_call_operand.vmem [shape: bf16[64,128], index: 1, kind: input, shape index: {}]   ;;  %s632_s2 = inlined_call_operand.vmem [shape: f32[1,128], index: 2, kind: input, shape index: {}]   ;;  %s633_s3 = inlined_call_operand.hbm [shape: f32[32,128], index: 3, kind: output, shape index: {}]  }
   0x1   :  { %10 = vsyncpa [#allocation3 + $0x1], 0  ;;  %s514_s12 = smov 0   ;;  %s516_s13 = smov 0  }
   0x2   :  { %s518_s14 = smov 0   ;;  %s520_s15 = smov 0  }
   0x3 LB: > { %s535_s16 = sadd.s32 4294967295, %s487_s15   ;;  %s342_s17 = sadd.s32 4294967294, %s487_s15   ;;  %s487_s15 = sphi %s520_s15, %s639_s15   ;;  %s483_s14 = sphi %s518_s14, %s638_s14   ;;  %s479_s13 = sphi %s516_s13, %s637_s13   ;;  %s475_s12 = sphi %s514_s12, %s636_s12  }
   0x4   : > { %s539_s18 = sadd.s32 1, %s487_s15   ;;  %s91_s19 = sadd.s32 1, %s483_s14 }
   0x5   : > { %s88_s20 = ssub.s32 %s487_s15, %s539_s18  ;;  %p101_p0 = scmp.ne.s32.totalorder %s483_s14, %s479_s13 }
   0x6   : > { %p89_p1 = scmp.eq.s32.totalorder %s88_s20, 0  ;;  %p102_p2 = scmp.eq.s32.totalorder %s535_s16, 1 }
   0x7   : > { %p107_p3 = scmp.ne.s32.totalorder %s479_s13, %s475_s12  ;;  %p108_p4 = scmp.eq.s32.totalorder %s342_s17, 1 }
   0x8   : > { %s550_s21 = scalar_select %p89_p1, %s483_s14, %s91_s19  }
   0x9   : > { %p552_p5 = por %p102_p2, %p101_p0  ;;  %p556_p6 = por %p108_p4, %p107_p3 }
   0xa   : > { %p345_p7 = scmp.ge.s32.totalorder %s487_s15, 1  ;;  %p141_p8 = scmp.lt.s32.totalorder %s487_s15, 3 }
   0xc   : > { %p142_p9 = pnand %p345_p7, %p141_p8 }
   0xd   : > { %s347_s28 = sshll.u32 (!%p142_p9), %s535_s16, 1  ;;  %s162_s10 = sand.u32 (!%p142_p9), 1, %s479_s13  }
   0xe   : > { %145 = sbr.rel (%p142_p9) target bundleno = 249 (0xf9), region = 32  ;;  %p166_p10 = scmp.lt.s32.totalorder (!%p142_p9), %s347_s28, 3 }
   0xf   : > { %s346_s11 = sshll.u32 (!%p142_p9), %s162_s10, 4  ;;  %s361_s25 = sshll.u32 (!%p142_p9), %s535_s16, 8 }
  0x10   : > { %s164_s20 = scalar_lea.vmem (!%p142_p9), [#allocation2], %s346_s11  ;;  %s590_s29 = scalar_lea.sflag (!%p142_p9), [#allocation3], %s162_s10 }
  0x11   : > { %s280_s24 = sshll.u32 (!%p142_p9), %s164_s20, 4  ;;  %s491_s16 = smov (!%p142_p9), [#allocation2]   ;;  %s583_s24 = int_to_ptr.vmem [resolvable:$true] %s280_s24 }
  0x12   : > { %s427_s30 = scalar_lea.vmem (!%p142_p9), %s583_s24, 256 }
  0x13   : > { %v422_v0 = vld [vmem:[%s631_s1 + $0x18] sm:$0xff]   ;;  %v489_v1 = vmov 0.0   ;;  %v423_v2 = vld [vmem:[%s631_s1 + $0x10] sm:$0xff]   ;;  %vm490_vm0 = vmmov 0   ;;  %s641_s28 = smov (!%p166_p10, %s347_s28), 3  ;;  %v424_v3 = vld [vmem:[%s631_s1 + $0x8] sm:$0xff]   ;;  %p428_p11 = scmp.ne.s32.totalorder %s583_s24, %s427_s30 }
  0x14   : > { %367 = vmatprep.subr.bf16.mxu0 %v489_v1  ;;  %375 = vmatprep.mubr.msk.bf16.mxu0 %vm490_vm0, %v489_v1  ;;  %s348_s4 = sshll.u32 %s641_s28, 2  ;;  %v425_v4 = vld [vmem:[%s631_s1] sm:$0xff]   ;;  %vm219_vm1 = vcmask 523264   ;;  %s588_s28 = scalar_lea.hbm %s633_s3, %s361_s25 }
  0x15   : > { %368 = vmatpush3.bf16.msra.mxu0 %v422_v0  ;;  %s169_s7 = scalar_lea.vmem %s630_s0, %s348_s4  ;;  %v349_v6 = vld [vmem:[%s632_s2] ss:$0 sm:$0xff]  ;;  %p429_p12 = pnand %p428_p11, %p552_p5 }
  0x16   : > { %369 = vmatprep.subr.bf16.mxu0 %v489_v1  ;;  %v426_v5 = vld [vmem:[%s169_s7] sm:$0xff]   ;;  %s431_s4 = sshll.u32 %s491_s16, 4  ;;  %s432_s4 = int_to_ptr.vmem [resolvable:$false] %s431_s4 }
  0x17   : > { %p430_p13 = pneg %p429_p12  ;;  %s433_s5 = scalar_lea.vmem %s432_s4, 512 }
  0x18   : > { %p434_p0 = scmp.lt.s32.totalorder %s583_s24, %s432_s4  ;;  %p435_p1 = scmp.lt.s32.totalorder %s433_s5, %s427_s30 }
  0x19   : > { %370 = vmatpush3.bf16.msra.mxu0 %v423_v2 }
  0x1a   : > { %371 = vmatprep.subr.bf16.mxu0 %v489_v1  ;;  %p436_p2 = por %p435_p1, %p434_p0 }
  0x1c   : > { %p437_p3 = pnand %p436_p2, %p430_p13 }
  0x1d   : > { %372 = vmatpush3.bf16.msra.mxu0 %v424_v3 }
  0x1e   : > { %373 = vmatprep.subr.bf16.mxu0 %v489_v1 }
  0x21   : > { %374 = vmatpush3.bf16.msra.mxu0 %v425_v4 }
  0x24   : > { %376 = vmatmul.mubr.msk.bf16.vlgmr.msra.gmra.mxu0 %vm219_vm1, %v426_v5 }
  0xe4   : > { %v257_v7 = vpop.f32.mrf.mxu0 }
  0xe5   : > { %v258_v8 = vadd.f32 %v349_v6, %v257_v7 }
  0xe6   : > { %v377_v9 = vpop.f32.mrf.mxu0 }
  0xe7   : > { %264 = vst [vmem:[%s164_s20] sm:$0xff] %v258_v8 }
  0xe8   : > { %v260_v10 = vpop.f32.mrf.mxu0 }
  0xe9   : > { %v261_v11 = vadd.f32 %v349_v6, %v260_v10 }
  0xea   : > { %v378_v12 = vpop.f32.mrf.mxu0 }
  0xeb   : > { %265 = vst [vmem:[%s164_s20 + $0x8] sm:$0xff] %v261_v11 }
  0xec   : > { %440 = shalt.err (!%p437_p3)
}
  0xed   : > { %s441_s6 = scalar_lea.hbm %s588_s28, 256  ;;  %s445_s9 = scalar_lea.hbm %s633_s3, 512 }
  0xee   : > { %p442_p4 = scmp.ne.s32.totalorder %s588_s28, %s441_s6  ;;  %p446_p9 = scmp.lt.s32.totalorder %s588_s28, %s633_s3 }
  0xef   : > { %p447_p10 = scmp.lt.s32.totalorder %s445_s9, %s441_s6 }
  0xf0   : > { %p443_p7 = pnand %p442_p4, %p552_p5 }
  0xf1   : > { %p448_p11 = por %p447_p10, %p446_p9 }
  0xf2   : > { %p444_p8 = pneg %p443_p7 }
  0xf4   : > { %p449_p12 = pnand %p448_p11, %p444_p8 }
  0xf6   : > { %452 = shalt.err (!%p449_p12)
}
  0xf7   : > { %s492_s17 = smov 128   ;;  %s493_s19 = smov 8  }
  0xf8   : > { %379 = dma.vmem_to_hbm [thread:$0]  (%p552_p5), %s583_s24, 256, %s588_s28, %s590_s29, %s492_s17, %s492_s17, %s493_s19  }
  0xf9 PF: > { %p385_p13 = scmp.ge.s32.totalorder %s487_s15, 2  ;;  %s295_s20 = sand.u32 1, %s475_s12  }
  0xfa   : > { %s296_s25 = scalar_lea.sflag [#allocation3], %s295_s20 }
  0xfb   : > { %p382_p0 = pnand %p385_p13, %p556_p6 }
  0xfd   : > { %p383_p1 = pneg %p382_p0 }
  0xff   : > { %470 = dma.done.wait (%p383_p1), %s296_s25, 256  }
 0x100   : > { %472 = vsyncadd (%p383_p1), %s296_s25, 4294967040  ;;  %p13_p2 = scmp.ge.s32.totalorder %s539_s18, 4   ;;  %s636_s12 = smov %s479_s13 }
 0x101   : > { %s637_s13 = smov %s483_s14  ;;  %s638_s14 = smov %s550_s21 }
 0x102   : > { %s639_s15 = smov %s539_s18  ;;  %15 = sbr.rel (!%p13_p2) target bundleno = 3 (0x3), region = 67 }
 0x107   :  { %301 = vsyncpa [#allocation3], 1 }
 0x108   :  { %303 = vsyncpa [#allocation3 + $0x1], 1 }

</bundles_post_ra>
